<compile_context>
chip_gen: v5e
topology: v5e:2x2
jax: 0.10.0
libtpu: 0.0.40
codegen_flags: <defaults>
</compile_context>

<pallas_src>
import jax
import jax.numpy as jnp
from jax.experimental import pallas as pl
from jax.experimental.pallas import tpu as pltpu

LANE = 128  # pad every feature dim to a multiple of the 128-wide lane axis


def _round_up(n, m):
    return ((n + m - 1) // m) * m


def _layer_dims(in_channels, out_channels, n_layers):
    """Replicates NLinearNormAct.__init__ layer sizing."""
    factor = (out_channels / in_channels) ** (1.0 / n_layers)
    dims = []
    penultimate = in_channels
    for i in range(n_layers - 1):
        d_in = int(in_channels * factor ** i)
        d_out = int(in_channels * factor ** (i + 1))
        dims.append((d_in, d_out))
        penultimate = d_out
    dims.append((penultimate, out_channels))
    return dims


def _kl_gaussian(mu, log_sigma):
    """KL( N(mu, exp(log_sigma)^2) || N(0,1) ), summed over all elements."""
    return 0.5 * jnp.sum(jnp.exp(2.0 * log_sigma) + mu * mu - 1.0 - 2.0 * log_sigma)


# ----------------------------------------------------------------------------
# Fused forward kernel: all (x @ W + b) -> ReLU layers in one invocation.
# Weights arrive already sampled (or mean) and already bf16; biases are f32.
# ----------------------------------------------------------------------------
def _make_forward_kernel(n_layers):
    def kernel(x_ref, *rest):
        y_ref = rest[-1]
        prefs = rest[:-1]              # 2 refs per layer: w (bf16), b (f32)
        h = x_ref[...]                 # (tb, F0_pad) f32
        for li in range(n_layers):
            w = prefs[2 * li][...]
            b = prefs[2 * li + 1][...]
            # bf16 MXU operands, f32 accumulation.
            h = jnp.dot(h.astype(jnp.bfloat16), w, preferred_element_type=jnp.float32)
            h = jnp.maximum(h + b, 0.0)
        y_ref[...] = h

    return kernel


# ----------------------------------------------------------------------------
# Parameter construction / sampling (plain JAX glue).
# ----------------------------------------------------------------------------
def make_params(key, in_channels, out_channels, n_layers):
    dims = _layer_dims(in_channels, out_channels, n_layers)
    params = []
    for (d_in, d_out) in dims:
        key, k_wmu, k_bmu = jax.random.split(key, 3)
        w_mu = 0.1 * jax.random.normal(k_wmu, (d_in, d_out), jnp.float32)
        w_ls = jnp.full((d_in, d_out), -5.0, jnp.float32)     # log sigma init
        b_mu = 0.1 * jax.random.normal(k_bmu, (1, d_out), jnp.float32)
        b_ls = jnp.full((1, d_out), -5.0, jnp.float32)
        params.append((w_mu, w_ls, b_mu, b_ls))
    return params, dims


def sample_params(params, key):
    """One reparameterized sample of every layer's (W, b), shared across the batch."""
    sampled = []
    for (w_mu, w_ls, b_mu, b_ls) in params:
        key, kw, kb = jax.random.split(key, 3)
        w = w_mu + jnp.exp(w_ls) * jax.random.normal(kw, w_mu.shape, jnp.float32)
        b = b_mu + jnp.exp(b_ls) * jax.random.normal(kb, b_mu.shape, jnp.float32)
        sampled.append((w, b))
    return sampled


# ----------------------------------------------------------------------------
# Host wrapper: sampling + KL in plain JAX, one fused pallas_call for the MLP.
# ----------------------------------------------------------------------------
def n_linear_norm_act_forward(x, params, *, key=None, batch_tile=256):
    """Forward of NLinearNormAct.

    params: list of (w_mu, w_log_sigma, b_mu, b_log_sigma), unpadded f32.
    key:    None -> deterministic mean-weight path; PRNGKey -> one reparameterized
            weight sample for the whole forward (standard Bayesian-layer semantics).
    Returns (y, kl_sum) like the PyTorch module.
    """
    assert batch_tile % 8 == 0
    B, f_in = x.shape
    assert f_in == params[0][0].shape[0]
    n_layers = len(params)

    # KL depends only on (mu, log_sigma) of the UNPADDED params: tiny elementwise+reduce,
    # XLA fuses it; no second kernel launch, no re-DMA of the parameters.
    kl = jnp.float32(0.0)
    for (w_mu, w_ls, b_mu, b_ls) in params:
        kl = kl + _kl_gaussian(w_mu, w_ls) + _kl_gaussian(b_mu, b_ls)

    # Weight sample (or mean), drawn once per forward, OUTSIDE the kernel.
    if key is None:
        wb = [(w_mu, b_mu) for (w_mu, _, b_mu, _) in params]
    else:
        wb = sample_params(params, key)

    # Pad to lane-dense (multiple-of-128) shapes with exact zeros; cast weights to bf16
    # so DMA bytes and resident VMEM are halved and no per-tile cast is needed.
    padded = []
    for (w, b) in wb:
        d_in, d_out = w.shape
        dp_in, dp_out = _round_up(d_in, LANE), _round_up(d_out, LANE)
        padded.append((
            jnp.pad(w, ((0, dp_in - d_in), (0, dp_out - d_out))).astype(jnp.bfloat16),
            jnp.pad(b, ((0, 0), (0, dp_out - d_out))),          # bias stays f32
        ))

    f0_pad = padded[0][0].shape[0]
    f_last = params[-1][2].shape[1]          # out_channels
    f_last_pad = padded[-1][0].shape[1]

    # Big batch tiles fill the 128/256-row MXU and cut per-grid-step overhead; clamp to
    # the (8-aligned) batch so tiny batches are not padded all the way up to batch_tile.
    tb = min(batch_tile, _round_up(B, 8))
    b_pad = _round_up(B, tb)
    x_pad = jnp.pad(x, ((0, b_pad - B), (0, f0_pad - f_in)))

    in_specs = [pl.BlockSpec((tb, f0_pad), lambda i: (i, 0))]
    for (w, b) in padded:
        fin_p, fout_p = w.shape
        # Constant index_maps keep the bf16 weights resident in VMEM across all tiles.
        # At these widths (<=128x128 bf16 ~ 32 KiB/layer) residency is negligible; when
        # scaling layer widths toward v7x's 64 MiB VMEM, single-buffer these specs
        # (pipeline_mode=pl.Buffered(1)) and/or add a trailing "arbitrary" K-reduction axis.
        in_specs.append(pl.BlockSpec((fin_p, fout_p), lambda i: (0, 0)))
        in_specs.append(pl.BlockSpec((1, fout_p), lambda i: (0, 0)))
    out_specs = pl.BlockSpec((tb, f_last_pad), lambda i: (i, 0))
    flat_params = [a for layer in padded for a in layer]

    y_pad = pl.pallas_call(
        _make_forward_kernel(n_layers),
        out_shape=jax.ShapeDtypeStruct((b_pad, f_last_pad), jnp.float32),
        grid=(b_pad // tb,),
        in_specs=in_specs,
        out_specs=out_specs,
        compiler_params=pltpu.CompilerParams(dimension_semantics=("parallel",)),
    )(x_pad, *flat_params)

    return y_pad[:B, :f_last], kl


# ----------------------------------------------------------------------------
# Pure-JAX reference (same bf16 MXU-operand cast, f32 accumulation).
# ----------------------------------------------------------------------------
def reference_forward(x, wb):
    h = x
    for (w, b) in wb:
        h = jnp.dot(h.astype(jnp.bfloat16), w.astype(jnp.bfloat16),
                    preferred_element_type=jnp.float32) + b
        h = jnp.maximum(h, 0.0)
    return h


if __name__ == "__main__":
    in_channels, out_channels, n_layers = 16, 64, 3
    batch = 512   # exercises tb=256 tiles and a 2-step "parallel" grid

    key = jax.random.PRNGKey(0)
    key, kx, kp = jax.random.split(key, 3)
    x = jax.random.normal(kx, (batch, in_channels), jnp.float32)
    params, dims = make_params(kp, in_channels, out_channels, n_layers)

    # 1) Deterministic (mean-weight) pass, checked against pure JAX.
    y_det, kl = n_linear_norm_act_forward(x, params, key=None)
    y_det = jax.block_until_ready(y_det)
    kl = jax.block_until_ready(kl)

    wb_mean = [(w_mu, b_mu) for (w_mu, _, b_mu, _) in params]
    y_ref = reference_forward(x, wb_mean)
    kl_ref = jnp.float32(0.0)
    for (w_mu, w_ls, b_mu, b_ls) in params:
        kl_ref = kl_ref + _kl_gaussian(w_mu, w_ls) + _kl_gaussian(b_mu, b_ls)

    assert y_det.shape == (batch, out_channels)
    assert jnp.allclose(y_det, y_ref, atol=1e-3, rtol=1e-3), \
        float(jnp.max(jnp.abs(y_det - y_ref)))
    assert jnp.allclose(kl, kl_ref, rtol=1e-5, atol=1e-4), (float(kl), float(kl_ref))

    # 2) Stochastic pass: one reparameterized weight sample per forward (host-side),
    #    compared against the pure-JAX reference using the identical sample.
    sample_key = jax.random.PRNGKey(1234)
    y_s, kl_s = n_linear_norm_act_forward(x, params, key=sample_key)
    y_s = jax.block_until_ready(y_s)
    kl_s = jax.block_until_ready(kl_s)

    y_s_ref = reference_forward(x, sample_params(params, sample_key))
    assert y_s.shape == (batch, out_channels)
    assert bool(jnp.all(jnp.isfinite(y_s)))
    assert jnp.allclose(y_s, y_s_ref, atol=1e-3, rtol=1e-3), \
        float(jnp.max(jnp.abs(y_s - y_s_ref)))
    assert jnp.allclose(kl_s, kl_ref, rtol=1e-5, atol=1e-4)
    # sigma = exp(-5) is tiny, so the sampled forward stays close to the mean forward.
    assert bool(jnp.max(jnp.abs(y_s - y_det)) < 0.5)

    print("KERNEL_OK")
</pallas_src>

<mosaic_0001>
module attributes {stable_mosaic.version = 11 : i64} {
  func.func @kernel(%arg0: i32, %arg1: memref<256x128xf32, #tpu.memory_space<vmem>>, %arg2: memref<128x128xbf16, #tpu.memory_space<vmem>>, %arg3: memref<1x128xf32, #tpu.memory_space<vmem>>, %arg4: memref<128x128xbf16, #tpu.memory_space<vmem>>, %arg5: memref<1x128xf32, #tpu.memory_space<vmem>>, %arg6: memref<128x128xbf16, #tpu.memory_space<vmem>>, %arg7: memref<1x128xf32, #tpu.memory_space<vmem>>, %arg8: memref<256x128xf32, #tpu.memory_space<vmem>>) attributes {dimension_semantics = [#tpu.dimension_semantics<parallel>], iteration_bounds = array<i64: 2>, scalar_prefetch = 0 : i64, scratch_operands = 0 : i64, tpu.core_type = #tpu.core_type<tc>, window_params = [{transform_indices = @transform_0, window_bounds = array<i64: 256, 128>}, {pipeline_mode = #tpu.pipeline_mode<synchronous>, transform_indices = @transform_1, window_bounds = array<i64: 128, 128>}, {pipeline_mode = #tpu.pipeline_mode<synchronous>, transform_indices = @transform_2, window_bounds = array<i64: 1, 128>}, {pipeline_mode = #tpu.pipeline_mode<synchronous>, transform_indices = @transform_3, window_bounds = array<i64: 128, 128>}, {pipeline_mode = #tpu.pipeline_mode<synchronous>, transform_indices = @transform_4, window_bounds = array<i64: 1, 128>}, {pipeline_mode = #tpu.pipeline_mode<synchronous>, transform_indices = @transform_5, window_bounds = array<i64: 128, 128>}, {pipeline_mode = #tpu.pipeline_mode<synchronous>, transform_indices = @transform_6, window_bounds = array<i64: 1, 128>}, {transform_indices = @transform_7, window_bounds = array<i64: 256, 128>}]} {
    %c0 = arith.constant 0 : index
    %c0_0 = arith.constant 0 : index
    %0 = vector.load %arg1[%c0, %c0_0] : memref<256x128xf32, #tpu.memory_space<vmem>>, vector<256x128xf32>
    %c0_1 = arith.constant 0 : index
    %c0_2 = arith.constant 0 : index
    %1 = vector.load %arg2[%c0_1, %c0_2] : memref<128x128xbf16, #tpu.memory_space<vmem>>, vector<128x128xbf16>
    %c0_3 = arith.constant 0 : index
    %c0_4 = arith.constant 0 : index
    %2 = vector.load %arg3[%c0_3, %c0_4] : memref<1x128xf32, #tpu.memory_space<vmem>>, vector<1x128xf32>
    %3 = arith.truncf %0 : vector<256x128xf32> to vector<256x128xbf16>
    %cst = arith.constant dense<0.000000e+00> : vector<256x128xf32>
    %4 = tpu.matmul %3, %1, %cst {dimension_numbers = #tpu.dot_dimension_numbers<[1], [0], [0], [1], [0, 0, 1, 1], [], []>} : vector<256x128xbf16>, vector<128x128xbf16>, vector<256x128xf32> -> vector<256x128xf32>
    %5 = vector.broadcast %2 : vector<1x128xf32> to vector<256x128xf32>
    %6 = arith.addf %4, %5 : vector<256x128xf32>
    %cst_5 = arith.constant 0.000000e+00 : f32
    %7 = vector.broadcast %cst_5 : f32 to vector<256x128xf32>
    %8 = arith.maximumf %6, %7 : vector<256x128xf32>
    %c0_6 = arith.constant 0 : index
    %c0_7 = arith.constant 0 : index
    %9 = vector.load %arg4[%c0_6, %c0_7] : memref<128x128xbf16, #tpu.memory_space<vmem>>, vector<128x128xbf16>
    %c0_8 = arith.constant 0 : index
    %c0_9 = arith.constant 0 : index
    %10 = vector.load %arg5[%c0_8, %c0_9] : memref<1x128xf32, #tpu.memory_space<vmem>>, vector<1x128xf32>
    %11 = arith.truncf %8 : vector<256x128xf32> to vector<256x128xbf16>
    %cst_10 = arith.constant dense<0.000000e+00> : vector<256x128xf32>
    %12 = tpu.matmul %11, %9, %cst_10 {dimension_numbers = #tpu.dot_dimension_numbers<[1], [0], [0], [1], [0, 0, 1, 1], [], []>} : vector<256x128xbf16>, vector<128x128xbf16>, vector<256x128xf32> -> vector<256x128xf32>
    %13 = vector.broadcast %10 : vector<1x128xf32> to vector<256x128xf32>
    %14 = arith.addf %12, %13 : vector<256x128xf32>
    %cst_11 = arith.constant 0.000000e+00 : f32
    %15 = vector.broadcast %cst_11 : f32 to vector<256x128xf32>
    %16 = arith.maximumf %14, %15 : vector<256x128xf32>
    %c0_12 = arith.constant 0 : index
    %c0_13 = arith.constant 0 : index
    %17 = vector.load %arg6[%c0_12, %c0_13] : memref<128x128xbf16, #tpu.memory_space<vmem>>, vector<128x128xbf16>
    %c0_14 = arith.constant 0 : index
    %c0_15 = arith.constant 0 : index
    %18 = vector.load %arg7[%c0_14, %c0_15] : memref<1x128xf32, #tpu.memory_space<vmem>>, vector<1x128xf32>
    %19 = arith.truncf %16 : vector<256x128xf32> to vector<256x128xbf16>
    %cst_16 = arith.constant dense<0.000000e+00> : vector<256x128xf32>
    %20 = tpu.matmul %19, %17, %cst_16 {dimension_numbers = #tpu.dot_dimension_numbers<[1], [0], [0], [1], [0, 0, 1, 1], [], []>} : vector<256x128xbf16>, vector<128x128xbf16>, vector<256x128xf32> -> vector<256x128xf32>
    %21 = vector.broadcast %18 : vector<1x128xf32> to vector<256x128xf32>
    %22 = arith.addf %20, %21 : vector<256x128xf32>
    %cst_17 = arith.constant 0.000000e+00 : f32
    %23 = vector.broadcast %cst_17 : f32 to vector<256x128xf32>
    %24 = arith.maximumf %22, %23 : vector<256x128xf32>
    %c0_18 = arith.constant 0 : index
    %c0_19 = arith.constant 0 : index
    %25 = vector.load %arg8[%c0_18, %c0_19] : memref<256x128xf32, #tpu.memory_space<vmem>>, vector<256x128xf32>
    tpu.vector_store %arg8[%c0_18, %c0_19], %24 {strides = array<i32>} : memref<256x128xf32, #tpu.memory_space<vmem>>, vector<256x128xf32>,
    return
  }
  func.func @transform_0(%arg0: i32) -> (i32, i32) {
    %c0_i32 = arith.constant 0 : i32
    %c0_i32_0 = arith.constant 0 : i32
    return %arg0, %c0_i32 : i32, i32
  }
  func.func @transform_1(%arg0: i32) -> (i32, i32) {
    %c0_i32 = arith.constant 0 : i32
    %c0_i32_0 = arith.constant 0 : i32
    %c0_i32_1 = arith.constant 0 : i32
    return %c0_i32, %c0_i32_0 : i32, i32
  }
  func.func @transform_2(%arg0: i32) -> (i32, i32) {
    %c0_i32 = arith.constant 0 : i32
    %c0_i32_0 = arith.constant 0 : i32
    %c0_i32_1 = arith.constant 0 : i32
    return %c0_i32, %c0_i32_0 : i32, i32
  }
  func.func @transform_3(%arg0: i32) -> (i32, i32) {
    %c0_i32 = arith.constant 0 : i32
    %c0_i32_0 = arith.constant 0 : i32
    %c0_i32_1 = arith.constant 0 : i32
    return %c0_i32, %c0_i32_0 : i32, i32
  }
  func.func @transform_4(%arg0: i32) -> (i32, i32) {
    %c0_i32 = arith.constant 0 : i32
    %c0_i32_0 = arith.constant 0 : i32
    %c0_i32_1 = arith.constant 0 : i32
    return %c0_i32, %c0_i32_0 : i32, i32
  }
  func.func @transform_5(%arg0: i32) -> (i32, i32) {
    %c0_i32 = arith.constant 0 : i32
    %c0_i32_0 = arith.constant 0 : i32
    %c0_i32_1 = arith.constant 0 : i32
    return %c0_i32, %c0_i32_0 : i32, i32
  }
  func.func @transform_6(%arg0: i32) -> (i32, i32) {
    %c0_i32 = arith.constant 0 : i32
    %c0_i32_0 = arith.constant 0 : i32
    %c0_i32_1 = arith.constant 0 : i32
    return %c0_i32, %c0_i32_0 : i32, i32
  }
  func.func @transform_7(%arg0: i32) -> (i32, i32) {
    %c0_i32 = arith.constant 0 : i32
    %c0_i32_0 = arith.constant 0 : i32
    return %arg0, %c0_i32 : i32, i32
  }
}

</mosaic_0001>

<bundles_post_ra>
// kernel: tpu_custom_call.1
= control target key start
LH: loop header
LB: loop body
LE: loop exit
PB: predicated region body
PF: predicated region fallthrough
CT: control target
= control target key end

     0   :  { %s1989_s0 = inlined_call_operand.hbm [shape: f32[512,128], index: 0, kind: input, shape index: {}]   ;;  %s1990_s1 = inlined_call_operand.hbm [shape: bf16[128,128], index: 1, kind: input, shape index: {}]   ;;  %s1991_s2 = inlined_call_operand.vmem [shape: f32[1,128], index: 2, kind: input, shape index: {}]   ;;  %s1992_s3 = inlined_call_operand.hbm [shape: bf16[128,128], index: 3, kind: input, shape index: {}]   ;;  %s1993_s4 = inlined_call_operand.vmem [shape: f32[1,128], index: 4, kind: input, shape index: {}]   ;;  %s1994_s5 = inlined_call_operand.hbm [shape: bf16[128,128], index: 5, kind: input, shape index: {}]   ;;  %s1995_s6 = inlined_call_operand.vmem [shape: f32[1,128], index: 6, kind: input, shape index: {}]   ;;  %s1996_s7 = inlined_call_operand.hbm [shape: f32[512,128], index: 7, kind: output, shape index: {}]  }
   0x1   :  { %1997 = sst [smem:[#allocation15_spill]] %s1990_s1 }
   0x2   :  { %12 = vsyncpa [#allocation3], 0 }
   0x3   :  { %14 = vsyncpa [#allocation3 + $0x1], 0 }
   0x4   :  { %15 = vsyncpa [#allocation6], 0 }
   0x5   :  { %16 = vsyncpa [#allocation9], 0 }
   0x6   :  { %17 = vsyncpa [#allocation4], 0 }
   0x7   :  { %19 = vsyncpa [#allocation4 + $0x1], 0  ;;  %s1645_s24 = smov 0   ;;  %s1647_s25 = smov 0  }
   0x8   :  { %s1649_s26 = smov 0   ;;  %s1651_s27 = smov 0  }
   0x9 LB: > { %s1666_s28 = sadd.s32 4294967295, %s1594_s27   ;;  %s1148_s29 = sadd.s32 4294967294, %s1594_s27   ;;  %s1594_s27 = sphi %s1651_s27, %s2009_s27   ;;  %s1590_s26 = sphi %s1649_s26, %s2008_s26   ;;  %s1586_s25 = sphi %s1647_s25, %s2007_s25   ;;  %s1582_s24 = sphi %s1645_s24, %s2006_s24  }
   0xa   : > { %p45_p0 = scmp.ne.s32.totalorder %s1586_s25, %s1582_s24  ;;  %p46_p1 = scmp.eq.s32.totalorder %s1666_s28, 0 }
   0xb   : > { %p195_p2 = scmp.eq.s32.totalorder %s1666_s28, 1  ;;  %p201_p3 = scmp.eq.s32.totalorder %s1148_s29, 1 }
   0xc   : > { %p1675_p4 = por %p46_p1, %p45_p0  ;;  %p1149_p5 = scmp.ge.s32.totalorder %s1594_s27, 1 }
   0xd   : > { %p1680_p6 = por %p201_p3, %p45_p0  ;;  %p208_p7 = scmp.lt.s32.totalorder %s1594_s27, 3 }
   0xe   : > { %s2000_s1 = sld [smem:[#allocation15_spill]]  ;;  %s1596_s13 = smov [#allocation5]  }
   0xf   : > { %p1688_p8 = pnand %p1149_p5, %p208_p7  ;;  %s221_s14 = sshll.u32 %s1596_s13, 4  ;;  %s222_s14 = int_to_ptr.vmem [resolvable:$true] %s221_s14 }
  0x10   : > { %s236_s18 = sshll.u32 %s1992_s3, 4  ;;  %s1597_s19 = smov 64   ;;  %s237_s18 = int_to_ptr.hbm [resolvable:$true] %s236_s18 }
  0x11   : > { %p1330_p9 = pneg %p1688_p8  ;;  %s1598_s20 = smov 4  }
  0x12   : > { %s1599_s21 = smov [#allocation7]   ;;  %s253_s9 = sshll.u32 %s1994_s5, 4  ;;  %s254_s9 = int_to_ptr.hbm [resolvable:$true] %s253_s9 }
  0x13   : > { %p1696_p10 = pnand %p1330_p9, %p46_p1  ;;  %s238_s22 = sshll.u32 %s1599_s21, 4  ;;  %s239_s22 = int_to_ptr.vmem [resolvable:$true] %s238_s22 }
  0x14   : > { %s219_s11 = sshll.u32 %s2000_s1, 4  ;;  %s1600_s10 = smov [#allocation8]   ;;  %s220_s11 = int_to_ptr.hbm [resolvable:$true] %s219_s11 }
  0x15   : > { %1333 = dma.hbm_to_vmem [thread:$0]  (!%p1696_p10), %s220_s11, 1024, %s222_s14, [#allocation6], %s1597_s19, %s1597_s19, %s1598_s20  }
  0x16   : > { %1336 = dma.hbm_to_vmem [thread:$0]  (!%p1696_p10), %s237_s18, 1024, %s239_s22, [#allocation6], %s1597_s19, %s1597_s19, %s1598_s20  }
  0x17   : > { %s255_s13 = sshll.u32 %s1600_s10, 4  ;;  %s1712_s11 = sadd.s32 1, %s1594_s27   ;;  %s256_s13 = int_to_ptr.vmem [resolvable:$true] %s255_s13 }
  0x18   : > { %1339 = dma.hbm_to_vmem [thread:$0]  (!%p1696_p10), %s254_s9, 1024, %s256_s13, [#allocation9], %s1597_s19, %s1597_s19, %s1598_s20  }
  0x19   : > { %s29_s14 = ssub.s32 %s1594_s27, %s1712_s11  ;;  %s32_s16 = sadd.s32 1, %s1590_s26 }
  0x1a   : > { %p30_p12 = scmp.eq.s32.totalorder %s29_s14, 0  ;;  %p39_p13 = scmp.ne.s32.totalorder %s1590_s26, %s1586_s25 }
  0x1b   : > { %p40_p0 = scmp.eq.s32.totalorder %s1594_s27, 0  ;;  %p1351_p3 = scmp.lt.s32.totalorder %s1594_s27, 2 }
  0x1c   : > { %s1724_s17 = scalar_select %p30_p12, %s1590_s26, %s32_s16  }
  0x1d   : > { %p41_p5 = por %p40_p0, %p39_p13  ;;  %p1728_p7 = por %p195_p2, %p39_p13 }
  0x1e   : > { %s272_s21 = sand.u32 1, %s1590_s26   ;;  %s1264_s22 = sshll.u32 %s1594_s27, 8 }
  0x1f   : > { %s1154_s15 = sshll.u32 %s272_s21, 8  ;;  %s281_s20 = scalar_lea.hbm %s1989_s0, %s1264_s22 }
  0x20   : > { %s282_s29 = sshll.u32 %s281_s20, 4  ;;  %s276_s9 = scalar_lea.vmem [#allocation2], %s1154_s15  ;;  %s283_s29 = int_to_ptr.hbm [resolvable:$true] %s282_s29 }
  0x21   : > { %s284_s10 = sshll.u32 %s276_s9, 4  ;;  %p1739_p9 = pnand %p1351_p3, %p41_p5  ;;  %s285_s10 = int_to_ptr.vmem [resolvable:$true] %s284_s10 }
  0x22   : > { %s273_s14 = scalar_lea.sflag [#allocation3], %s272_s21  ;;  %s1490_s16 = sshra.s32 %s283_s29, 4  ;;  %s1491_s16 = int_to_ptr.hbm [resolvable:$true] %s1490_s16 }
  0x23   : > { %s1492_s1 = scalar_lea.hbm %s1491_s16, 256  ;;  %p1494_p10 = pneg %p1739_p9 }
  0x24   : > { %p1493_p2 = scmp.ne.s32.totalorder %s1491_s16, %s1492_s1  ;;  %s1497_s23 = scalar_lea.hbm %s1989_s0, 512 }
  0x25   : > { %p1498_p0 = scmp.lt.s32.totalorder %s1491_s16, %s1989_s0  ;;  %p1499_p3 = scmp.lt.s32.totalorder %s1497_s23, %s1492_s1 }
  0x26   : > { %p1495_p12 = pnand %p1494_p10, %p1493_p2 }
  0x27   : > { %p1500_p5 = por %p1499_p3, %p1498_p0 }
  0x28   : > { %p1496_p13 = pneg %p1495_p12 }
  0x2a   : > { %p1501_p11 = pnand %p1500_p5, %p1496_p13 }
  0x2c   : > { %1504 = shalt.err (!%p1501_p11)
}
  0x2d   : > { %s1601_s21 = smov 128   ;;  %s1602_s9 = smov 8  }
  0x2e   : > { %1343 = dma.hbm_to_vmem [thread:$0]  (!%p1739_p9), %s283_s29, 4096, %s285_s10, %s273_s14, %s1601_s21, %s1601_s21, %s1602_s9  }
  0x2f   : > { %296 = sbr.rel (%p1688_p8) target bundleno = 693 (0x2b5), region = 48  ;;  %s1756_s22 = sand.u32 (!%p1688_p8), 1, %s1586_s25  }
  0x30   : > { %s1158_s16 = sshll.u32 (!%p1688_p8), %s1756_s22, 8  ;;  %s299_s1 = scalar_lea.sflag (!%p1688_p8), [#allocation3], %s1756_s22 }
  0x31   : > { %s1762_s15 = scalar_lea.vmem (!%p1688_p8), [#allocation2], %s1158_s16 }
  0x34   : > { %1565 = dma.done.wait (%p1675_p4), %s299_s1, 4096  }
  0x35   : > { %1567 = vsyncadd (%p1675_p4), %s299_s1, 4294963200 }
  0x36   : > { %1569 = dma.done.wait (%p46_p1), [#allocation6], 2048  }
  0x37   : > { %1571 = vsyncadd (%p46_p1), [#allocation6], 4294965248 }
  0x38   : > { %1573 = dma.done.wait (%p46_p1), [#allocation9], 1024  }
  0x39   : > { %1575 = vsyncadd (%p46_p1), [#allocation9], 4294966272  ;;  %v1272_v0 = vld [vmem:[#allocation5 + $0x38] sm:$0xff]  ;;  %v1271_v1 = vld [vmem:[#allocation5 + $0x30] sm:$0xff]  ;;  %s1885_s23 = scalar_lea.vmem [#allocation10], %s1158_s16  ;;  %s1289_s19 = sshll.u32 %s1666_s28, 8 }
  0x3a   : > { %467 = vmatpush.bf16.msra.mxu0 %v1272_v0  ;;  %1290 = vmatpush.bf16.msra.mxu3 %v1272_v0  ;;  %v1270_v2 = vld [vmem:[#allocation5 + $0x28] sm:$0xff]  ;;  %v1269_v3 = vld [vmem:[#allocation5 + $0x20] sm:$0xff]  ;;  %v1268_v4 = vld [vmem:[#allocation5 + $0x18] sm:$0xff]  ;;  %s1042_s9 = scalar_lea.hbm %s1996_s7, %s1289_s19  ;;  %s1043_s16 = sshll.u32 %s1885_s23, 4  ;;  %s1044_s16 = int_to_ptr.vmem [resolvable:$true] %s1043_s16 }
  0x3b   : > { %v1267_v5 = vld [vmem:[#allocation5 + $0x10] sm:$0xff]  ;;  %v1266_v6 = vld [vmem:[#allocation5 + $0x8] sm:$0xff]  ;;  %v1265_v7 = vld [vmem:[#allocation5] sm:$0xff]  ;;  %s1045_s1 = sshll.u32 %s1042_s9, 4  ;;  %s1540_s10 = scalar_lea.hbm %s1996_s7, 512  ;;  %s1046_s1 = int_to_ptr.hbm [resolvable:$true] %s1045_s1 }
  0x3c   : > { %v351_v8 = vld [vmem:[%s1762_s15] sm:$0xff]  ;;  %v352_v9 = vld [vmem:[%s1762_s15 + $0x8] sm:$0xff]  ;;  %v353_v11 = vld [vmem:[%s1762_s15 + $0x10] sm:$0xff]  ;;  %s1534_s30 = sshra.s32 %s1046_s1, 4  ;;  %s1535_s30 = int_to_ptr.hbm [resolvable:$true] %s1534_s30 }
  0x3d   : > { %v400_v10 = vpack.c.bf16 %v352_v9, %v351_v8  ;;  %v354_v12 = vld [vmem:[%s1762_s15 + $0x18] sm:$0xff]  ;;  %v355_v14 = vld [vmem:[%s1762_s15 + $0x20] sm:$0xff]  ;;  %v356_v15 = vld [vmem:[%s1762_s15 + $0x28] sm:$0xff]  ;;  %s1536_s28 = scalar_lea.hbm %s1535_s30, 256  ;;  %p1541_p11 = scmp.lt.s32.totalorder %s1535_s30, %s1996_s7 }
  0x3e   : > { %468 = vmatpush.bf16.msra.mxu0 %v1271_v1  ;;  %1291 = vmatpush.bf16.msra.mxu3 %v1271_v1  ;;  %v401_v13 = vpack.c.bf16 %v354_v12, %v353_v11  ;;  %v402_v16 = vpack.c.bf16 %v356_v15, %v355_v14  ;;  %v357_v17 = vld [vmem:[%s1762_s15 + $0x30] sm:$0xff]  ;;  %v358_v18 = vld [vmem:[%s1762_s15 + $0x38] sm:$0xff]  ;;  %v375_v20 = vld [vmem:[%s1762_s15 + $0xc0] sm:$0xff]  ;;  %p1537_p1 = scmp.ne.s32.totalorder %s1535_s30, %s1536_s28  ;;  %p1542_p9 = scmp.lt.s32.totalorder %s1540_s10, %s1536_s28 }
  0x3f   : > { %v403_v19 = vpack.c.bf16 %v358_v18, %v357_v17  ;;  %v376_v21 = vld [vmem:[%s1762_s15 + $0xc8] sm:$0xff]  ;;  %v359_v23 = vld [vmem:[%s1762_s15 + $0x40] sm:$0xff]  ;;  %v377_v26 = vld [vmem:[%s1762_s15 + $0xd0] sm:$0xff] }
  0x40   : > { %v412_v22 = vpack.c.bf16 %v376_v21, %v375_v20  ;;  %v360_v24 = vld [vmem:[%s1762_s15 + $0x48] sm:$0xff]  ;;  %v378_v27 = vld [vmem:[%s1762_s15 + $0xd8] sm:$0xff]  ;;  %v361_v30 = vld [vmem:[%s1762_s15 + $0x50] sm:$0xff]  ;;  %p1538_p4 = pnand %p1537_p1, %p1728_p7  ;;  %p1543_p2 = por %p1542_p9, %p1541_p11 }
  0x41   : > { %v404_v25 = vpack.c.bf16 %v360_v24, %v359_v23  ;;  %v1280_v28 = vld [vmem:[#allocation7 + $0x38] sm:$0xff]  ;;  %v413_v29 = vpack.c.bf16 %v378_v27, %v377_v26  ;;  %v1279_v33 = vld [vmem:[#allocation7 + $0x30] sm:$0xff]  ;;  %v379_v34 = vld [vmem:[%s1762_s15 + $0xe0] sm:$0xff] }
  0x42   : > { %469 = vmatpush.bf16.msra.mxu0 %v1270_v2  ;;  %1292 = vmatpush.bf16.msra.mxu3 %v1270_v2  ;;  %v362_v31 = vld [vmem:[%s1762_s15 + $0x58] sm:$0xff]  ;;  %v1278_v35 = vld [vmem:[#allocation7 + $0x28] sm:$0xff]  ;;  %v1277_v38 = vld [vmem:[#allocation7 + $0x20] sm:$0xff]  ;;  %p1539_p8 = pneg %p1538_p4 }
  0x43   : > { %672 = vmatpush.bf16.msra.mxu1 %v1280_v28  ;;  %v405_v32 = vpack.c.bf16 %v362_v31, %v361_v30  ;;  %v380_v36 = vld [vmem:[%s1762_s15 + $0xe8] sm:$0xff]  ;;  %v363_v39 = vld [vmem:[%s1762_s15 + $0x60] sm:$0xff]  ;;  %v1276_v41 = vld [vmem:[#allocation7 + $0x18] sm:$0xff] }
  0x44   : > { %v414_v37 = vpack.c.bf16 %v380_v36, %v379_v34  ;;  %v364_v40 = vld [vmem:[%s1762_s15 + $0x68] sm:$0xff]  ;;  %v1275_v43 = vld [vmem:[#allocation7 + $0x10] sm:$0xff]  ;;  %v1273_v45 = vld [vmem:[#allocation7] sm:$0xff]  ;;  %p1544_p10 = pnand %p1543_p2, %p1539_p8 }
  0x45   : > { %v406_v42 = vpack.c.bf16 %v364_v40, %v363_v39  ;;  %v1274_v44 = vld [vmem:[#allocation7 + $0x8] sm:$0xff]  ;;  %v381_v46 = vld [vmem:[%s1762_s15 + $0xf0] sm:$0xff]  ;;  %v382_v47 = vld [vmem:[%s1762_s15 + $0xf8] sm:$0xff] }
  0x46   : > { %470 = vmatpush.bf16.msra.mxu0 %v1269_v3  ;;  %1293 = vmatpush.bf16.msra.mxu3 %v1269_v3  ;;  %v365_v48 = vld [vmem:[%s1762_s15 + $0x70] sm:$0xff]  ;;  %v366_v49 = vld [vmem:[%s1762_s15 + $0x78] sm:$0xff]  ;;  %v415_v50 = vpack.c.bf16 %v382_v47, %v381_v46  ;;  %v367_v52 = vld [vmem:[%s1762_s15 + $0x80] sm:$0xff] }
  0x47   : > { %673 = vmatpush.bf16.msra.mxu1 %v1279_v33  ;;  %v407_v51 = vpack.c.bf16 %v366_v49, %v365_v48  ;;  %v368_v53 = vld [vmem:[%s1762_s15 + $0x88] sm:$0xff]  ;;  %v1805_v56 = vld [vmem:[%s1991_s2] ss:$0 sm:$0xff]  ;;  %v369_v62 = vld [vmem:[%s1762_s15 + $0x90] sm:$0xff] }
  0x48   : > { %v408_v54 = vpack.c.bf16 %v368_v53, %v367_v52  ;;  %v370_v63 = vld [vmem:[%s1762_s15 + $0x98] sm:$0xff]  ;;  %v371_v8 = vld [vmem:[%s1762_s15 + $0xa0] sm:$0xff]  ;;  %v372_v9 = vld [vmem:[%s1762_s15 + $0xa8] sm:$0xff] }
  0x49   : > { %v409_v1 = vpack.c.bf16 %v370_v63, %v369_v62  ;;  %v410_v11 = vpack.c.bf16 %v372_v9, %v371_v8  ;;  %v373_v18 = vld [vmem:[%s1762_s15 + $0xb0] sm:$0xff]  ;;  %v1286_v62 = vld [vmem:[#allocation8 + $0x28] sm:$0xff]  ;;  %v1285_v63 = vld [vmem:[#allocation8 + $0x20] sm:$0xff] }
  0x4a   : > { %471 = vmatpush.bf16.msra.mxu0 %v1268_v4  ;;  %1294 = vmatpush.bf16.msra.mxu3 %v1268_v4 }
  0x4b   : > { %674 = vmatpush.bf16.msra.mxu1 %v1278_v35 }
  0x4e   : > { %472 = vmatpush.bf16.msra.mxu0 %v1267_v5  ;;  %1295 = vmatpush.bf16.msra.mxu3 %v1267_v5 }
  0x4f   : > { %675 = vmatpush.bf16.msra.mxu1 %v1277_v38 }
  0x52   : > { %473 = vmatpush.bf16.msra.mxu0 %v1266_v6  ;;  %1296 = vmatpush.bf16.msra.mxu3 %v1266_v6 }
  0x53   : > { %676 = vmatpush.bf16.msra.mxu1 %v1276_v41 }
  0x56   : > { %474 = vmatpush.bf16.msra.mxu0 %v1265_v7  ;;  %1297 = vmatpush.bf16.msra.mxu3 %v1265_v7 }
  0x57   : > { %677 = vmatpush.bf16.msra.mxu1 %v1275_v43 }
  0x59   : > { %475 = vmatmul.bf16.vlgmr.msra.gmra.mxu0 %v400_v10  ;;  %535 = vmatmul.bf16.vlgmr.msra.gmra.mxu3 %v412_v22 }
  0x5a   : > { %1298 = vmatpush.bf16.msrb.mxu3 %v1280_v28 }
  0x5b   : > { %678 = vmatpush.bf16.msra.mxu1 %v1274_v44 }
  0x5e   : > { %1299 = vmatpush.bf16.msrb.mxu3 %v1279_v33 }
  0x5f   : > { %679 = vmatpush.bf16.msra.mxu1 %v1273_v45 }
  0x62   : > { %1300 = vmatpush.bf16.msrb.mxu3 %v1278_v35 }
  0x66   : > { %1301 = vmatpush.bf16.msrb.mxu3 %v1277_v38 }
  0x69   : > { %480 = vmatmul.bf16.gmra.mxu0 %v401_v13  ;;  %540 = vmatmul.bf16.gmra.mxu3 %v413_v29 }
  0x6a   : > { %1302 = vmatpush.bf16.msrb.mxu3 %v1276_v41 }
  0x6e   : > { %1303 = vmatpush.bf16.msrb.mxu3 %v1275_v43 }
  0x72   : > { %1304 = vmatpush.bf16.msrb.mxu3 %v1274_v44 }
  0x76   : > { %1305 = vmatpush.bf16.msrb.mxu3 %v1273_v45 }
  0x79   : > { %485 = vmatmul.bf16.gmra.mxu0 %v402_v16  ;;  %545 = vmatmul.bf16.gmra.mxu3 %v414_v37 }
  0x89   : > { %490 = vmatmul.bf16.gmra.mxu0 %v403_v19  ;;  %550 = vmatmul.bf16.gmra.mxu3 %v415_v50  ;;  %v374_v19 = vld [vmem:[%s1762_s15 + $0xb8] sm:$0xff]  ;;  %s1031_s15 = scalar_lea.sflag [#allocation4], %s1756_s22 }
  0x8a   : > { %v411_v21 = vpack.c.bf16 %v374_v19, %v373_v18  ;;  %v1288_v50 = vld [vmem:[#allocation8 + $0x38] sm:$0xff] }
  0x8b   : > { %877 = vmatpush.bf16.msra.mxu2 %v1288_v50  ;;  %1306 = vmatpush.bf16.msra.mxu3 %v1288_v50 }
  0x99   : > { %495 = vmatmul.bf16.gmra.mxu0 %v404_v25 }
  0xa9   : > { %500 = vmatmul.bf16.gmra.mxu0 %v405_v32 }
  0xb9   : > { %505 = vmatmul.bf16.gmra.mxu0 %v406_v42 }
  0xc9   : > { %510 = vmatmul.bf16.gmra.mxu0 %v407_v51 }
  0xd6   : > { %v476_v55 = vpop.f32.mrf.mxu0 }
  0xd7   : > { %v477_v57 = vadd.f32 %v1805_v56, %v476_v55 }
  0xd9   : > { %515 = vmatmul.bf16.gmra.mxu0 %v408_v54  ;;  %v556_v60 = vmax.f32 %v477_v57, 0.0 }
  0xdc   : > { %v536_v30 = vpop.f32.mrf.mxu3 }
  0xdd   : > { %v537_v32 = vadd.f32 %v1805_v56, %v536_v30 }
  0xde   : > { %v478_v58 = vpop.f32.mrf.mxu0 }
  0xdf   : > { %v479_v59 = vadd.f32 %v1805_v56, %v478_v58  ;;  %v580_v38 = vmax.f32 %v537_v32, 0.0  ;;  %v1287_v58 = vld [vmem:[#allocation8 + $0x30] sm:$0xff] }
  0xe0   : > { %878 = vmatpush.bf16.msra.mxu2 %v1287_v58  ;;  %1307 = vmatpush.bf16.msra.mxu3 %v1287_v58 }
  0xe1   : > { %v557_v61 = vmax.f32 %v479_v59, 0.0 }
  0xe3   : > { %v605_v0 = vpack.c.bf16 %v557_v61, %v556_v60 }
  0xe4   : > { %v538_v35 = vpop.f32.mrf.mxu3  ;;  %879 = vmatpush.bf16.msra.mxu2 %v1286_v62  ;;  %1308 = vmatpush.bf16.msra.mxu3 %v1286_v62 }
  0xe5   : > { %680 = vmatmul.bf16.vlgmr.msra.gmra.mxu1 %v605_v0  ;;  %v539_v39 = vadd.f32 %v1805_v56, %v538_v35 }
  0xe6   : > { %v481_v2 = vpop.f32.mrf.mxu0 }
  0xe7   : > { %v482_v3 = vadd.f32 %v1805_v56, %v481_v2  ;;  %v581_v41 = vmax.f32 %v539_v39, 0.0 }
  0xe8   : > { %880 = vmatpush.bf16.msra.mxu2 %v1285_v63  ;;  %1309 = vmatpush.bf16.msra.mxu3 %v1285_v63 }
  0xe9   : > { %520 = vmatmul.bf16.gmra.mxu0 %v409_v1  ;;  %v558_v6 = vmax.f32 %v482_v3, 0.0  ;;  %v617_v42 = vpack.c.bf16 %v581_v41, %v580_v38  ;;  %v1842_v38 = vld [vmem:[%s1993_s4] ss:$0 sm:$0xff] }
  0xeb   : > { %740 = vmatmul.bf16.vlgmr.msrb.gmra.mxu3 %v617_v42 }
  0xec   : > { %v541_v44 = vpop.f32.mrf.mxu3 }
  0xed   : > { %v542_v46 = vadd.f32 %v1805_v56, %v541_v44 }
  0xee   : > { %v483_v4 = vpop.f32.mrf.mxu0 }
  0xef   : > { %v484_v5 = vadd.f32 %v1805_v56, %v483_v4  ;;  %v582_v53 = vmax.f32 %v542_v46, 0.0 }
  0xf1   : > { %v559_v7 = vmax.f32 %v484_v5, 0.0  ;;  %v1284_v5 = vld [vmem:[#allocation8 + $0x18] sm:$0xff] }
  0xf2   : > { %881 = vmatpush.bf16.msra.mxu2 %v1284_v5  ;;  %1310 = vmatpush.bf16.msra.mxu3 %v1284_v5 }
  0xf3   : > { %v606_v10 = vpack.c.bf16 %v559_v7, %v558_v6 }
  0xf4   : > { %v543_v49 = vpop.f32.mrf.mxu3 }
  0xf5   : > { %685 = vmatmul.bf16.gmra.mxu1 %v606_v10  ;;  %v544_v54 = vadd.f32 %v1805_v56, %v543_v49 }
  0xf6   : > { %v486_v12 = vpop.f32.mrf.mxu0 }
  0xf7   : > { %v487_v13 = vadd.f32 %v1805_v56, %v486_v12  ;;  %v583_v57 = vmax.f32 %v544_v54, 0.0  ;;  %v1283_v12 = vld [vmem:[#allocation8 + $0x10] sm:$0xff] }
  0xf8   : > { %882 = vmatpush.bf16.msra.mxu2 %v1283_v12  ;;  %1311 = vmatpush.bf16.msra.mxu3 %v1283_v12 }
  0xf9   : > { %525 = vmatmul.bf16.gmra.mxu0 %v410_v11  ;;  %v560_v16 = vmax.f32 %v487_v13, 0.0  ;;  %v618_v59 = vpack.c.bf16 %v583_v57, %v582_v53 }
  0xfb   : > { %745 = vmatmul.bf16.gmra.mxu3 %v618_v59 }
  0xfc   : > { %v546_v61 = vpop.f32.mrf.mxu3 }
  0xfd   : > { %v547_v1 = vadd.f32 %v1805_v56, %v546_v61 }
  0xfe   : > { %v488_v14 = vpop.f32.mrf.mxu0 }
  0xff   : > { %v489_v15 = vadd.f32 %v1805_v56, %v488_v14  ;;  %v584_v8 = vmax.f32 %v547_v1, 0.0 }
 0x101   : > { %v561_v17 = vmax.f32 %v489_v15, 0.0 }
 0x103   : > { %v607_v20 = vpack.c.bf16 %v561_v17, %v560_v16  ;;  %v1282_v16 = vld [vmem:[#allocation8 + $0x8] sm:$0xff]  ;;  %v1281_v17 = vld [vmem:[#allocation8] sm:$0xff] }
 0x104   : > { %v548_v4 = vpop.f32.mrf.mxu3  ;;  %883 = vmatpush.bf16.msra.mxu2 %v1282_v16  ;;  %1312 = vmatpush.bf16.msra.mxu3 %v1282_v16 }
 0x105   : > { %690 = vmatmul.bf16.gmra.mxu1 %v607_v20  ;;  %v549_v9 = vadd.f32 %v1805_v56, %v548_v4 }
 0x106   : > { %v491_v22 = vpop.f32.mrf.mxu0 }
 0x107   : > { %v492_v23 = vadd.f32 %v1805_v56, %v491_v22  ;;  %v585_v11 = vmax.f32 %v549_v9, 0.0 }
 0x108   : > { %884 = vmatpush.bf16.msra.mxu2 %v1281_v17  ;;  %1313 = vmatpush.bf16.msra.mxu3 %v1281_v17 }
 0x109   : > { %530 = vmatmul.bf16.gmra.mxu0 %v411_v21  ;;  %v562_v26 = vmax.f32 %v492_v23, 0.0  ;;  %v619_v13 = vpack.c.bf16 %v585_v11, %v584_v8 }
 0x10b   : > { %750 = vmatmul.bf16.gmra.mxu3 %v619_v13 }
 0x10c   : > { %v551_v15 = vpop.f32.mrf.mxu3 }
 0x10d   : > { %v552_v19 = vadd.f32 %v1805_v56, %v551_v15 }
 0x10e   : > { %v493_v24 = vpop.f32.mrf.mxu0 }
 0x10f   : > { %v494_v25 = vadd.f32 %v1805_v56, %v493_v24 }
 0x111   : > { %v563_v27 = vmax.f32 %v494_v25, 0.0  ;;  %v586_v25 = vmax.f32 %v552_v19, 0.0 }
 0x113   : > { %v608_v28 = vpack.c.bf16 %v563_v27, %v562_v26 }
 0x114   : > { %v553_v22 = vpop.f32.mrf.mxu3 }
 0x115   : > { %695 = vmatmul.bf16.gmra.mxu1 %v608_v28  ;;  %v554_v26 = vadd.f32 %v1805_v56, %v553_v22 }
 0x116   : > { %v496_v29 = vpop.f32.mrf.mxu0 }
 0x117   : > { %v497_v31 = vadd.f32 %v1805_v56, %v496_v29  ;;  %v587_v28 = vmax.f32 %v554_v26, 0.0 }
 0x119   : > { %v564_v36 = vmax.f32 %v497_v31, 0.0  ;;  %v620_v29 = vpack.c.bf16 %v587_v28, %v586_v25 }
 0x11b   : > { %755 = vmatmul.bf16.gmra.mxu3 %v620_v29 }
 0x11e   : > { %v498_v33 = vpop.f32.mrf.mxu0 }
 0x11f   : > { %v499_v34 = vadd.f32 %v1805_v56, %v498_v33 }
 0x121   : > { %v565_v37 = vmax.f32 %v499_v34, 0.0 }
 0x123   : > { %v609_v40 = vpack.c.bf16 %v565_v37, %v564_v36 }
 0x125   : > { %700 = vmatmul.bf16.gmra.mxu1 %v609_v40 }
 0x126   : > { %v501_v43 = vpop.f32.mrf.mxu0 }
 0x127   : > { %v502_v45 = vadd.f32 %v1805_v56, %v501_v43 }
 0x129   : > { %v566_v51 = vmax.f32 %v502_v45, 0.0 }
 0x12e   : > { %v503_v47 = vpop.f32.mrf.mxu0 }
 0x12f   : > { %v504_v48 = vadd.f32 %v1805_v56, %v503_v47 }
 0x131   : > { %v567_v52 = vmax.f32 %v504_v48, 0.0 }
 0x133   : > { %v610_v55 = vpack.c.bf16 %v567_v52, %v566_v51 }
 0x135   : > { %705 = vmatmul.bf16.gmra.mxu1 %v610_v55 }
 0x136   : > { %v506_v60 = vpop.f32.mrf.mxu0 }
 0x137   : > { %v507_v0 = vadd.f32 %v1805_v56, %v506_v60 }
 0x139   : > { %v568_v6 = vmax.f32 %v507_v0, 0.0 }
 0x13e   : > { %v508_v2 = vpop.f32.mrf.mxu0 }
 0x13f   : > { %v509_v3 = vadd.f32 %v1805_v56, %v508_v2 }
 0x141   : > { %v569_v7 = vmax.f32 %v509_v3, 0.0 }
 0x143   : > { %v611_v10 = vpack.c.bf16 %v569_v7, %v568_v6 }
 0x145   : > { %710 = vmatmul.bf16.gmra.mxu1 %v611_v10 }
 0x146   : > { %v511_v14 = vpop.f32.mrf.mxu0 }
 0x147   : > { %v512_v18 = vadd.f32 %v1805_v56, %v511_v14 }
 0x149   : > { %v570_v23 = vmax.f32 %v512_v18, 0.0 }
 0x14e   : > { %v513_v20 = vpop.f32.mrf.mxu0 }
 0x14f   : > { %v514_v21 = vadd.f32 %v1805_v56, %v513_v20 }
 0x151   : > { %v571_v24 = vmax.f32 %v514_v21, 0.0 }
 0x153   : > { %v612_v27 = vpack.c.bf16 %v571_v24, %v570_v23 }
 0x155   : > { %715 = vmatmul.bf16.gmra.mxu1 %v612_v27 }
 0x156   : > { %v516_v30 = vpop.f32.mrf.mxu0 }
 0x157   : > { %v517_v31 = vadd.f32 %v1805_v56, %v516_v30 }
 0x159   : > { %v572_v34 = vmax.f32 %v517_v31, 0.0 }
 0x15e   : > { %v518_v32 = vpop.f32.mrf.mxu0 }
 0x15f   : > { %v519_v33 = vadd.f32 %v1805_v56, %v518_v32 }
 0x161   : > { %v573_v35 = vmax.f32 %v519_v33, 0.0 }
 0x162   : > { %v681_v36 = vpop.f32.mrf.mxu1 }
 0x163   : > { %v613_v37 = vpack.c.bf16 %v573_v35, %v572_v34  ;;  %v682_v40 = vadd.f32 %v1842_v38, %v681_v36 }
 0x165   : > { %720 = vmatmul.bf16.gmra.mxu1 %v613_v37  ;;  %v761_v43 = vmax.f32 %v682_v40, 0.0 }
 0x166   : > { %v521_v39 = vpop.f32.mrf.mxu0 }
 0x167   : > { %v522_v44 = vadd.f32 %v1805_v56, %v521_v39 }
 0x169   : > { %v574_v49 = vmax.f32 %v522_v44, 0.0 }
 0x16a   : > { %v683_v41 = vpop.f32.mrf.mxu1 }
 0x16b   : > { %v684_v42 = vadd.f32 %v1842_v38, %v683_v41 }
 0x16d   : > { %v762_v45 = vmax.f32 %v684_v42, 0.0 }
 0x16e   : > { %v523_v46 = vpop.f32.mrf.mxu0  ;;  %v741_v26 = vpop.f32.mrf.mxu3 }
 0x16f   : > { %v524_v47 = vadd.f32 %v1805_v56, %v523_v46  ;;  %v810_v48 = vpack.c.bf16 %v762_v45, %v761_v43  ;;  %v742_v31 = vadd.f32 %v1842_v38, %v741_v26 }
 0x171   : > { %v575_v50 = vmax.f32 %v524_v47, 0.0  ;;  %885 = vmatmul.bf16.vlgmr.msra.gmra.mxu2 %v810_v48  ;;  %v785_v34 = vmax.f32 %v742_v31, 0.0 }
 0x172   : > { %v686_v51 = vpop.f32.mrf.mxu1 }
 0x173   : > { %v614_v52 = vpack.c.bf16 %v575_v50, %v574_v49  ;;  %v687_v54 = vadd.f32 %v1842_v38, %v686_v51 }
 0x175   : > { %725 = vmatmul.bf16.gmra.mxu1 %v614_v52  ;;  %v763_v58 = vmax.f32 %v687_v54, 0.0 }
 0x176   : > { %v526_v53 = vpop.f32.mrf.mxu0  ;;  %v743_v33 = vpop.f32.mrf.mxu3 }
 0x177   : > { %v527_v59 = vadd.f32 %v1805_v56, %v526_v53  ;;  %v744_v35 = vadd.f32 %v1842_v38, %v743_v33 }
 0x179   : > { %v576_v0 = vmax.f32 %v527_v59, 0.0  ;;  %v786_v36 = vmax.f32 %v744_v35, 0.0 }
 0x17a   : > { %v688_v55 = vpop.f32.mrf.mxu1 }
 0x17b   : > { %v689_v57 = vadd.f32 %v1842_v38, %v688_v55  ;;  %v822_v37 = vpack.c.bf16 %v786_v36, %v785_v34 }
 0x17d   : > { %v764_v60 = vmax.f32 %v689_v57, 0.0  ;;  %945 = vmatmul.bf16.vlgmr.msra.gmra.mxu3 %v822_v37 }
 0x17e   : > { %v528_v61 = vpop.f32.mrf.mxu0  ;;  %v746_v41 = vpop.f32.mrf.mxu3 }
 0x17f   : > { %v529_v62 = vadd.f32 %v1805_v56, %v528_v61  ;;  %v811_v63 = vpack.c.bf16 %v764_v60, %v763_v58  ;;  %v747_v46 = vadd.f32 %v1842_v38, %v746_v41 }
 0x181   : > { %v577_v1 = vmax.f32 %v529_v62, 0.0  ;;  %890 = vmatmul.bf16.gmra.mxu2 %v811_v63  ;;  %v787_v49 = vmax.f32 %v747_v46, 0.0 }
 0x182   : > { %v691_v2 = vpop.f32.mrf.mxu1 }
 0x183   : > { %v615_v3 = vpack.c.bf16 %v577_v1, %v576_v0  ;;  %v692_v5 = vadd.f32 %v1842_v38, %v691_v2 }
 0x185   : > { %730 = vmatmul.bf16.gmra.mxu1 %v615_v3  ;;  %v765_v8 = vmax.f32 %v692_v5, 0.0 }
 0x186   : > { %v531_v4 = vpop.f32.mrf.mxu0  ;;  %v748_v48 = vpop.f32.mrf.mxu3 }
 0x187   : > { %v532_v9 = vadd.f32 %v1805_v56, %v531_v4  ;;  %v749_v50 = vadd.f32 %v1842_v38, %v748_v48 }
 0x189   : > { %v578_v14 = vmax.f32 %v532_v9, 0.0  ;;  %v788_v51 = vmax.f32 %v749_v50, 0.0 }
 0x18a   : > { %v693_v6 = vpop.f32.mrf.mxu1 }
 0x18b   : > { %v694_v7 = vadd.f32 %v1842_v38, %v693_v6  ;;  %v823_v52 = vpack.c.bf16 %v788_v51, %v787_v49 }
 0x18d   : > { %v766_v10 = vmax.f32 %v694_v7, 0.0  ;;  %950 = vmatmul.bf16.gmra.mxu3 %v823_v52 }
 0x18e   : > { %v533_v11 = vpop.f32.mrf.mxu0  ;;  %v751_v55 = vpop.f32.mrf.mxu3 }
 0x18f   : > { %v534_v12 = vadd.f32 %v1805_v56, %v533_v11  ;;  %v812_v13 = vpack.c.bf16 %v766_v10, %v765_v8  ;;  %v752_v61 = vadd.f32 %v1842_v38, %v751_v55 }
 0x191   : > { %v579_v15 = vmax.f32 %v534_v12, 0.0  ;;  %895 = vmatmul.bf16.gmra.mxu2 %v812_v13  ;;  %v789_v0 = vmax.f32 %v752_v61, 0.0 }
 0x192   : > { %v696_v16 = vpop.f32.mrf.mxu1 }
 0x193   : > { %v616_v17 = vpack.c.bf16 %v579_v15, %v578_v14  ;;  %v697_v18 = vadd.f32 %v1842_v38, %v696_v16 }
 0x195   : > { %735 = vmatmul.bf16.gmra.mxu1 %v616_v17  ;;  %v767_v21 = vmax.f32 %v697_v18, 0.0 }
 0x196   : > { %v753_v63 = vpop.f32.mrf.mxu3 }
 0x197   : > { %v754_v1 = vadd.f32 %v1842_v38, %v753_v63 }
 0x199   : > { %v790_v2 = vmax.f32 %v754_v1, 0.0 }
 0x19a   : > { %v698_v19 = vpop.f32.mrf.mxu1 }
 0x19b   : > { %v699_v20 = vadd.f32 %v1842_v38, %v698_v19  ;;  %v824_v3 = vpack.c.bf16 %v790_v2, %v789_v0 }
 0x19d   : > { %v768_v22 = vmax.f32 %v699_v20, 0.0  ;;  %955 = vmatmul.bf16.gmra.mxu3 %v824_v3 }
 0x19e   : > { %v756_v6 = vpop.f32.mrf.mxu3 }
 0x19f   : > { %v813_v23 = vpack.c.bf16 %v768_v22, %v767_v21  ;;  %v757_v11 = vadd.f32 %v1842_v38, %v756_v6 }
 0x1a1   : > { %900 = vmatmul.bf16.gmra.mxu2 %v813_v23  ;;  %v791_v14 = vmax.f32 %v757_v11, 0.0 }
 0x1a2   : > { %v701_v24 = vpop.f32.mrf.mxu1 }
 0x1a3   : > { %v702_v25 = vadd.f32 %v1842_v38, %v701_v24  ;;  %v1879_v24 = vld [vmem:[%s1995_s6] ss:$0 sm:$0xff] }
 0x1a5   : > { %v769_v28 = vmax.f32 %v702_v25, 0.0 }
 0x1a6   : > { %v758_v13 = vpop.f32.mrf.mxu3 }
 0x1a7   : > { %v759_v15 = vadd.f32 %v1842_v38, %v758_v13 }
 0x1a9   : > { %v792_v16 = vmax.f32 %v759_v15, 0.0 }
 0x1aa   : > { %v703_v56 = vpop.f32.mrf.mxu1 }
 0x1ab   : > { %v704_v27 = vadd.f32 %v1842_v38, %v703_v56  ;;  %v825_v17 = vpack.c.bf16 %v792_v16, %v791_v14 }
 0x1ad   : > { %v770_v29 = vmax.f32 %v704_v27, 0.0  ;;  %960 = vmatmul.bf16.gmra.mxu3 %v825_v17 }
 0x1af   : > { %v814_v30 = vpack.c.bf16 %v770_v29, %v769_v28 }
 0x1b1   : > { %905 = vmatmul.bf16.gmra.mxu2 %v814_v30 }
 0x1b2   : > { %v706_v32 = vpop.f32.mrf.mxu1 }
 0x1b3   : > { %v707_v39 = vadd.f32 %v1842_v38, %v706_v32 }
 0x1b5   : > { %v771_v43 = vmax.f32 %v707_v39, 0.0 }
 0x1ba   : > { %v708_v40 = vpop.f32.mrf.mxu1 }
 0x1bb   : > { %v709_v42 = vadd.f32 %v1842_v38, %v708_v40 }
 0x1bd   : > { %v772_v44 = vmax.f32 %v709_v42, 0.0 }
 0x1bf   : > { %v815_v45 = vpack.c.bf16 %v772_v44, %v771_v43 }
 0x1c1   : > { %910 = vmatmul.bf16.gmra.mxu2 %v815_v45 }
 0x1c2   : > { %v711_v47 = vpop.f32.mrf.mxu1 }
 0x1c3   : > { %v712_v53 = vadd.f32 %v1842_v38, %v711_v47 }
 0x1c5   : > { %v773_v58 = vmax.f32 %v712_v53, 0.0 }
 0x1ca   : > { %v713_v54 = vpop.f32.mrf.mxu1 }
 0x1cb   : > { %v714_v57 = vadd.f32 %v1842_v38, %v713_v54 }
 0x1cd   : > { %v774_v59 = vmax.f32 %v714_v57, 0.0 }
 0x1cf   : > { %v816_v60 = vpack.c.bf16 %v774_v59, %v773_v58 }
 0x1d1   : > { %915 = vmatmul.bf16.gmra.mxu2 %v816_v60 }
 0x1d2   : > { %v716_v62 = vpop.f32.mrf.mxu1 }
 0x1d3   : > { %v717_v4 = vadd.f32 %v1842_v38, %v716_v62 }
 0x1d5   : > { %v775_v8 = vmax.f32 %v717_v4, 0.0 }
 0x1da   : > { %v718_v5 = vpop.f32.mrf.mxu1 }
 0x1db   : > { %v719_v7 = vadd.f32 %v1842_v38, %v718_v5 }
 0x1dd   : > { %v776_v9 = vmax.f32 %v719_v7, 0.0 }
 0x1df   : > { %v817_v10 = vpack.c.bf16 %v776_v9, %v775_v8 }
 0x1e1   : > { %920 = vmatmul.bf16.gmra.mxu2 %v817_v10 }
 0x1e2   : > { %v721_v12 = vpop.f32.mrf.mxu1 }
 0x1e3   : > { %v722_v18 = vadd.f32 %v1842_v38, %v721_v12 }
 0x1e5   : > { %v777_v21 = vmax.f32 %v722_v18, 0.0 }
 0x1ea   : > { %v723_v19 = vpop.f32.mrf.mxu1 }
 0x1eb   : > { %v724_v20 = vadd.f32 %v1842_v38, %v723_v19 }
 0x1ed   : > { %v778_v22 = vmax.f32 %v724_v20, 0.0 }
 0x1ef   : > { %v818_v23 = vpack.c.bf16 %v778_v22, %v777_v21 }
 0x1f1   : > { %925 = vmatmul.bf16.gmra.mxu2 %v818_v23 }
 0x1f2   : > { %v726_v25 = vpop.f32.mrf.mxu1 }
 0x1f3   : > { %v727_v28 = vadd.f32 %v1842_v38, %v726_v25 }
 0x1f4   : > { %v886_v56 = vpop.f32.mrf.mxu2 }
 0x1f5   : > { %v887_v26 = vadd.f32 %v1879_v24, %v886_v56  ;;  %v779_v32 = vmax.f32 %v727_v28, 0.0 }
 0x1f7   : > { %v966_v27 = vmax.f32 %v887_v26, 0.0 }
 0x1f9   : > { %998 = vst [vmem:[%s1885_s23] sm:$0xff] %v966_v27 }
 0x1fa   : > { %v728_v29 = vpop.f32.mrf.mxu1 }
 0x1fb   : > { %v729_v30 = vadd.f32 %v1842_v38, %v728_v29 }
 0x1fc   : > { %v888_v31 = vpop.f32.mrf.mxu2 }
 0x1fd   : > { %v780_v33 = vmax.f32 %v729_v30, 0.0  ;;  %v889_v34 = vadd.f32 %v1879_v24, %v888_v31 }
 0x1ff   : > { %v967_v35 = vmax.f32 %v889_v34, 0.0  ;;  %v819_v36 = vpack.c.bf16 %v780_v33, %v779_v32 }
 0x200   : > { %v946_v10 = vpop.f32.mrf.mxu3 }
 0x201   : > { %999 = vst [vmem:[%s1885_s23 + $0x8] sm:$0xff] %v967_v35  ;;  %930 = vmatmul.bf16.gmra.mxu2 %v819_v36  ;;  %v947_v13 = vadd.f32 %v1879_v24, %v946_v10 }
 0x202   : > { %v731_v37 = vpop.f32.mrf.mxu1 }
 0x203   : > { %v732_v42 = vadd.f32 %v1842_v38, %v731_v37  ;;  %v990_v14 = vmax.f32 %v947_v13, 0.0 }
 0x204   : > { %v891_v39 = vpop.f32.mrf.mxu2 }
 0x205   : > { %v892_v40 = vadd.f32 %v1879_v24, %v891_v39  ;;  %v781_v46 = vmax.f32 %v732_v42, 0.0  ;;  %1022 = vst [vmem:[%s1885_s23 + $0xc0] sm:$0xff] %v990_v14 }
 0x207   : > { %v968_v41 = vmax.f32 %v892_v40, 0.0 }
 0x208   : > { %v948_v16 = vpop.f32.mrf.mxu3 }
 0x209   : > { %1000 = vst [vmem:[%s1885_s23 + $0x10] sm:$0xff] %v968_v41  ;;  %v949_v18 = vadd.f32 %v1879_v24, %v948_v16 }
 0x20a   : > { %v733_v43 = vpop.f32.mrf.mxu1 }
 0x20b   : > { %v734_v44 = vadd.f32 %v1842_v38, %v733_v43  ;;  %v991_v20 = vmax.f32 %v949_v18, 0.0 }
 0x20c   : > { %v893_v45 = vpop.f32.mrf.mxu2 }
 0x20d   : > { %v782_v47 = vmax.f32 %v734_v44, 0.0  ;;  %v894_v48 = vadd.f32 %v1879_v24, %v893_v45  ;;  %1023 = vst [vmem:[%s1885_s23 + $0xc8] sm:$0xff] %v991_v20 }
 0x20f   : > { %v969_v49 = vmax.f32 %v894_v48, 0.0  ;;  %v820_v50 = vpack.c.bf16 %v782_v47, %v781_v46 }
 0x210   : > { %v951_v22 = vpop.f32.mrf.mxu3 }
 0x211   : > { %1001 = vst [vmem:[%s1885_s23 + $0x18] sm:$0xff] %v969_v49  ;;  %935 = vmatmul.bf16.gmra.mxu2 %v820_v50  ;;  %v952_v56 = vadd.f32 %v1879_v24, %v951_v22 }
 0x212   : > { %v736_v51 = vpop.f32.mrf.mxu1 }
 0x213   : > { %v737_v55 = vadd.f32 %v1842_v38, %v736_v51  ;;  %v992_v26 = vmax.f32 %v952_v56, 0.0 }
 0x214   : > { %v896_v52 = vpop.f32.mrf.mxu2 }
 0x215   : > { %v897_v53 = vadd.f32 %v1879_v24, %v896_v52  ;;  %v783_v60 = vmax.f32 %v737_v55, 0.0  ;;  %1024 = vst [vmem:[%s1885_s23 + $0xd0] sm:$0xff] %v992_v26 }
 0x217   : > { %v970_v54 = vmax.f32 %v897_v53, 0.0 }
 0x218   : > { %v953_v28 = vpop.f32.mrf.mxu3 }
 0x219   : > { %1002 = vst [vmem:[%s1885_s23 + $0x20] sm:$0xff] %v970_v54  ;;  %v954_v30 = vadd.f32 %v1879_v24, %v953_v28 }
 0x21a   : > { %v738_v57 = vpop.f32.mrf.mxu1 }
 0x21b   : > { %v739_v58 = vadd.f32 %v1842_v38, %v738_v57  ;;  %v993_v32 = vmax.f32 %v954_v30, 0.0 }
 0x21c   : > { %v898_v59 = vpop.f32.mrf.mxu2 }
 0x21d   : > { %v784_v61 = vmax.f32 %v739_v58, 0.0  ;;  %v899_v62 = vadd.f32 %v1879_v24, %v898_v59  ;;  %1025 = vst [vmem:[%s1885_s23 + $0xd8] sm:$0xff] %v993_v32 }
 0x21f   : > { %v971_v63 = vmax.f32 %v899_v62, 0.0  ;;  %v821_v0 = vpack.c.bf16 %v784_v61, %v783_v60 }
 0x220   : > { %v956_v34 = vpop.f32.mrf.mxu3 }
 0x221   : > { %1003 = vst [vmem:[%s1885_s23 + $0x28] sm:$0xff] %v971_v63  ;;  %940 = vmatmul.bf16.gmra.mxu2 %v821_v0  ;;  %v957_v37 = vadd.f32 %v1879_v24, %v956_v34 }
 0x223   : > { %v994_v39 = vmax.f32 %v957_v37, 0.0 }
 0x224   : > { %v901_v1 = vpop.f32.mrf.mxu2 }
 0x225   : > { %v902_v2 = vadd.f32 %v1879_v24, %v901_v1  ;;  %1026 = vst [vmem:[%s1885_s23 + $0xe0] sm:$0xff] %v994_v39 }
 0x227   : > { %v972_v3 = vmax.f32 %v902_v2, 0.0 }
 0x228   : > { %v958_v41 = vpop.f32.mrf.mxu3 }
 0x229   : > { %1004 = vst [vmem:[%s1885_s23 + $0x30] sm:$0xff] %v972_v3  ;;  %v959_v43 = vadd.f32 %v1879_v24, %v958_v41 }
 0x22b   : > { %v995_v45 = vmax.f32 %v959_v43, 0.0 }
 0x22c   : > { %v903_v4 = vpop.f32.mrf.mxu2 }
 0x22d   : > { %v904_v38 = vadd.f32 %v1879_v24, %v903_v4  ;;  %1027 = vst [vmem:[%s1885_s23 + $0xe8] sm:$0xff] %v995_v45 }
 0x22f   : > { %v973_v5 = vmax.f32 %v904_v38, 0.0 }
 0x230   : > { %v961_v47 = vpop.f32.mrf.mxu3 }
 0x231   : > { %1005 = vst [vmem:[%s1885_s23 + $0x38] sm:$0xff] %v973_v5  ;;  %v962_v50 = vadd.f32 %v1879_v24, %v961_v47 }
 0x233   : > { %v996_v51 = vmax.f32 %v962_v50, 0.0 }
 0x234   : > { %v906_v6 = vpop.f32.mrf.mxu2 }
 0x235   : > { %v907_v7 = vadd.f32 %v1879_v24, %v906_v6  ;;  %1028 = vst [vmem:[%s1885_s23 + $0xf0] sm:$0xff] %v996_v51 }
 0x237   : > { %v974_v8 = vmax.f32 %v907_v7, 0.0 }
 0x238   : > { %v963_v53 = vpop.f32.mrf.mxu3 }
 0x239   : > { %1006 = vst [vmem:[%s1885_s23 + $0x40] sm:$0xff] %v974_v8  ;;  %v964_v55 = vadd.f32 %v1879_v24, %v963_v53 }
 0x23b   : > { %v997_v58 = vmax.f32 %v964_v55, 0.0 }
 0x23c   : > { %v908_v9 = vpop.f32.mrf.mxu2 }
 0x23d   : > { %v909_v11 = vadd.f32 %v1879_v24, %v908_v9  ;;  %1029 = vst [vmem:[%s1885_s23 + $0xf8] sm:$0xff] %v997_v58 }
 0x23f   : > { %v975_v12 = vmax.f32 %v909_v11, 0.0 }
 0x241   : > { %1007 = vst [vmem:[%s1885_s23 + $0x48] sm:$0xff] %v975_v12 }
 0x244   : > { %v911_v15 = vpop.f32.mrf.mxu2 }
 0x245   : > { %v912_v17 = vadd.f32 %v1879_v24, %v911_v15 }
 0x247   : > { %v976_v19 = vmax.f32 %v912_v17, 0.0 }
 0x249   : > { %1008 = vst [vmem:[%s1885_s23 + $0x50] sm:$0xff] %v976_v19 }
 0x24c   : > { %v913_v21 = vpop.f32.mrf.mxu2 }
 0x24d   : > { %v914_v23 = vadd.f32 %v1879_v24, %v913_v21 }
 0x24f   : > { %v977_v25 = vmax.f32 %v914_v23, 0.0 }
 0x251   : > { %1009 = vst [vmem:[%s1885_s23 + $0x58] sm:$0xff] %v977_v25 }
 0x254   : > { %v916_v27 = vpop.f32.mrf.mxu2 }
 0x255   : > { %v917_v29 = vadd.f32 %v1879_v24, %v916_v27 }
 0x257   : > { %v978_v31 = vmax.f32 %v917_v29, 0.0 }
 0x259   : > { %1010 = vst [vmem:[%s1885_s23 + $0x60] sm:$0xff] %v978_v31 }
 0x25c   : > { %v918_v33 = vpop.f32.mrf.mxu2 }
 0x25d   : > { %v919_v35 = vadd.f32 %v1879_v24, %v918_v33 }
 0x25f   : > { %v979_v36 = vmax.f32 %v919_v35, 0.0 }
 0x261   : > { %1011 = vst [vmem:[%s1885_s23 + $0x68] sm:$0xff] %v979_v36 }
 0x264   : > { %v921_v40 = vpop.f32.mrf.mxu2 }
 0x265   : > { %v922_v42 = vadd.f32 %v1879_v24, %v921_v40 }
 0x267   : > { %v980_v44 = vmax.f32 %v922_v42, 0.0 }
 0x269   : > { %1012 = vst [vmem:[%s1885_s23 + $0x70] sm:$0xff] %v980_v44 }
 0x26c   : > { %v923_v46 = vpop.f32.mrf.mxu2 }
 0x26d   : > { %v924_v48 = vadd.f32 %v1879_v24, %v923_v46 }
 0x26f   : > { %v981_v49 = vmax.f32 %v924_v48, 0.0 }
 0x271   : > { %1013 = vst [vmem:[%s1885_s23 + $0x78] sm:$0xff] %v981_v49 }
 0x274   : > { %v926_v52 = vpop.f32.mrf.mxu2 }
 0x275   : > { %v927_v54 = vadd.f32 %v1879_v24, %v926_v52 }
 0x277   : > { %v982_v57 = vmax.f32 %v927_v54, 0.0 }
 0x279   : > { %1014 = vst [vmem:[%s1885_s23 + $0x80] sm:$0xff] %v982_v57 }
 0x27c   : > { %v928_v59 = vpop.f32.mrf.mxu2 }
 0x27d   : > { %v929_v60 = vadd.f32 %v1879_v24, %v928_v59 }
 0x27f   : > { %v983_v61 = vmax.f32 %v929_v60, 0.0 }
 0x281   : > { %1015 = vst [vmem:[%s1885_s23 + $0x88] sm:$0xff] %v983_v61 }
 0x284   : > { %v931_v62 = vpop.f32.mrf.mxu2 }
 0x285   : > { %v932_v63 = vadd.f32 %v1879_v24, %v931_v62 }
 0x287   : > { %v984_v0 = vmax.f32 %v932_v63, 0.0 }
 0x289   : > { %1016 = vst [vmem:[%s1885_s23 + $0x90] sm:$0xff] %v984_v0 }
 0x28c   : > { %v933_v1 = vpop.f32.mrf.mxu2 }
 0x28d   : > { %v934_v2 = vadd.f32 %v1879_v24, %v933_v1 }
 0x28f   : > { %v985_v3 = vmax.f32 %v934_v2, 0.0 }
 0x291   : > { %1017 = vst [vmem:[%s1885_s23 + $0x98] sm:$0xff] %v985_v3 }
 0x294   : > { %v936_v4 = vpop.f32.mrf.mxu2 }
 0x295   : > { %v937_v38 = vadd.f32 %v1879_v24, %v936_v4 }
 0x297   : > { %v986_v5 = vmax.f32 %v937_v38, 0.0 }
 0x299   : > { %1018 = vst [vmem:[%s1885_s23 + $0xa0] sm:$0xff] %v986_v5 }
 0x29c   : > { %v938_v6 = vpop.f32.mrf.mxu2 }
 0x29d   : > { %v939_v7 = vadd.f32 %v1879_v24, %v938_v6 }
 0x29f   : > { %v987_v8 = vmax.f32 %v939_v7, 0.0 }
 0x2a1   : > { %1019 = vst [vmem:[%s1885_s23 + $0xa8] sm:$0xff] %v987_v8 }
 0x2a4   : > { %v941_v9 = vpop.f32.mrf.mxu2 }
 0x2a5   : > { %v942_v10 = vadd.f32 %v1879_v24, %v941_v9 }
 0x2a7   : > { %v988_v11 = vmax.f32 %v942_v10, 0.0 }
 0x2a9   : > { %1020 = vst [vmem:[%s1885_s23 + $0xb0] sm:$0xff] %v988_v11 }
 0x2ac   : > { %v943_v12 = vpop.f32.mrf.mxu2 }
 0x2ad   : > { %v944_v13 = vadd.f32 %v1879_v24, %v943_v12 }
 0x2af   : > { %v989_v14 = vmax.f32 %v944_v13, 0.0 }
 0x2b1   : > { %1021 = vst [vmem:[%s1885_s23 + $0xb8] sm:$0xff] %v989_v14 }
 0x2b2   : > { %1547 = shalt.err (!%p1544_p10)
}
 0x2b3   : > { %s1603_s22 = smov 128   ;;  %s1604_s23 = smov 8  }
 0x2b4   : > { %1328 = dma.vmem_to_hbm [thread:$0]  (%p1728_p7), %s1044_s16, 4096, %s1046_s1, %s1031_s15, %s1603_s22, %s1603_s22, %s1604_s23  }
 0x2b5 PF: > { %s1060_s19 = sand.u32 1, %s1582_s24   ;;  %p2005_p12 = scmp.ge.s32.totalorder %s1594_s27, 2 }
 0x2b6   : > { %s1061_s20 = scalar_lea.sflag [#allocation4], %s1060_s19 }
 0x2b7   : > { %p1345_p13 = pnand %p2005_p12, %p1680_p6 }
 0x2b9   : > { %p1346_p0 = pneg %p1345_p13 }
 0x2bb   : > { %1577 = dma.done.wait (%p1346_p0), %s1061_s20, 4096  }
 0x2bc   : > { %1579 = vsyncadd (%p1346_p0), %s1061_s20, 4294963200  ;;  %p22_p3 = scmp.ge.s32.totalorder %s1712_s11, 4   ;;  %s2006_s24 = smov %s1586_s25 }
 0x2bd   : > { %s2007_s25 = smov %s1590_s26  ;;  %s2008_s26 = smov %s1724_s17 }
 0x2be   : > { %s2009_s27 = smov %s1712_s11  ;;  %24 = sbr.rel (!%p22_p3) target bundleno = 9 (0x9), region = 105 }
 0x2c3   :  { %1067 = vsyncpa [#allocation3], 1 }
 0x2c4   :  { %1069 = vsyncpa [#allocation3 + $0x1], 1 }
 0x2c5   :  { %1070 = vsyncpa [#allocation6], 1 }
 0x2c6   :  { %1071 = vsyncpa [#allocation9], 1 }
 0x2c7   :  { %1072 = vsyncpa [#allocation4], 1 }
 0x2c8   :  { %1074 = vsyncpa [#allocation4 + $0x1], 1 }

</bundles_post_ra>
